<compile_context>
chip_gen: v7x
topology: tpu7x:2x2x1
jax: 0.10.0
libtpu: 0.0.40
codegen_flags: <defaults>
</compile_context>

<pallas_src>
import jax
import jax.numpy as jnp
from jax.experimental import pallas as pl
from jax.experimental.pallas import tpu as pltpu


def _mlp_kernel(xt_ref, w1t_ref, b1_ref, w2_ref, b2_ref, o_ref):
    # fc1 on the MXU: [H, D] @ [D, TB] -> [H, TB], bf16 inputs, f32 accumulation.
    h = jnp.dot(w1t_ref[...], xt_ref[...], preferred_element_type=jnp.float32)
    # Bias + ReLU in f32 (lane-dense: TB on the 128-lane axis).
    h = jnp.maximum(h + b1_ref[...], jnp.float32(0.0))
    # fc2 as a VPU multiply + sublane reduction over H -> lane-dense (1, TB) row.
    o_ref[...] = jnp.sum(h * w2_ref[...], axis=0, keepdims=True) + b2_ref[0]


def _round_up(n, m):
    return ((n + m - 1) // m) * m


def influence_network_forward(x, w1, b1, w2, b2, *, block_b=8192):
    """Pallas forward: fc2(relu(fc1(x))).

    x  : [B, D]  float
    w1 : [D, H]  float   (torch fc1.weight.T)
    b1 : [H]     float
    w2 : [H, 1]  float   (torch fc2.weight.T)
    b2 : [1]     float
    returns [B, 1] float32
    """
    x = jnp.asarray(x, jnp.float32)
    B, D = x.shape
    H = w1.shape[1]

    # ---- batch-tile choice -------------------------------------------------
    # Tiny/ragged batches: one full-array tile (block == full array, so the
    # (8,128) divisibility rule does not apply).  Larger batches: lane-dense
    # tiles (multiple of 128), capped at block_b, and at least 2 tiles so a
    # 2-TC chip (v7x) can split the batch across cores.
    if B <= 256:
        tb = B
    else:
        tb = min(block_b, _round_up(pl.cdiv(B, 2), 128))
    n_tiles = pl.cdiv(B, tb)
    Bp = n_tiles * tb

    # ---- operand prep (batch-on-lanes, bf16 fc1 inputs) ---------------------
    # cast + transpose fuse into a single XLA op.  TODO(synk): have the
    # producer emit x as bf16 [D, B] directly to drop this extra HBM pass.
    x_t = x.astype(jnp.bfloat16).T                      # [D, B]
    if Bp != B:
        x_t = jnp.pad(x_t, ((0, 0), (0, Bp - B)))       # pad lane axis

    w1_t = w1.astype(jnp.bfloat16).T                    # [H, D], VMEM-resident
    b1_col = b1.reshape(H, 1).astype(jnp.float32)       # broadcast over lanes
    w2_col = w2.reshape(H, 1).astype(jnp.float32)
    b2_s = b2.reshape(1).astype(jnp.float32)            # scalar, lives in SMEM

    out_row = pl.pallas_call(
        _mlp_kernel,
        out_shape=jax.ShapeDtypeStruct((1, Bp), jnp.float32),
        grid=(n_tiles,),
        in_specs=[
            # x^T tile; for v5e with very deep batches consider
            # pipeline_mode=pl.Buffered(3) if the per-step DMA is still exposed.
            pl.BlockSpec((D, tb), lambda i: (0, i)),
            pl.BlockSpec((H, D), lambda i: (0, 0)),      # W1^T (resident)
            pl.BlockSpec((H, 1), lambda i: (0, 0)),      # b1 column (resident)
            pl.BlockSpec((H, 1), lambda i: (0, 0)),      # W2 column (resident)
            pl.BlockSpec(memory_space=pltpu.MemorySpace.SMEM),  # b2 scalar
        ],
        out_specs=pl.BlockSpec((1, tb), lambda i: (0, i)),      # lane-dense row
        compiler_params=pltpu.CompilerParams(
            dimension_semantics=("parallel",),  # shard batch tiles across TCs (v7x)
        ),
    )(x_t, w1_t, b1_col, w2_col, b2_s)

    # Drop padded columns (they hold relu(b1)·w2 + b2 garbage) and restore [B, 1].
    return out_row[0, :B].reshape(B, 1)


def init_params(key, dim, hidden_size):
    """Deterministic init mimicking nn.Linear's uniform(-1/sqrt(fan_in), 1/sqrt(fan_in))."""
    k1, k2, k3, k4 = jax.random.split(key, 4)
    bound1 = 1.0 / jnp.sqrt(dim)
    bound2 = 1.0 / jnp.sqrt(hidden_size)
    w1 = jax.random.uniform(k1, (dim, hidden_size), jnp.float32, -bound1, bound1)
    b1 = jax.random.uniform(k2, (hidden_size,), jnp.float32, -bound1, bound1)
    w2 = jax.random.uniform(k3, (hidden_size, 1), jnp.float32, -bound2, bound2)
    b2 = jax.random.uniform(k4, (1,), jnp.float32, -bound2, bound2)
    return w1, b1, w2, b2


def _reference(x, w1, b1, w2, b2):
    return jnp.maximum(x @ w1 + b1[None, :], 0.0) @ w2 + b2[None, :]


if __name__ == "__main__":
    key = jax.random.PRNGKey(0)
    kx, kp = jax.random.split(key)

    DIM, HIDDEN = 16, 32
    w1, b1, w2, b2 = init_params(kp, DIM, HIDDEN)

    # Exercise: tiny single full tile (B=8), ragged multi-tile (B=1000, padded
    # lane axis), and a small forced-multi-tile sweep via block_b override.
    cases = [
        (8, {}),                      # single full-array tile
        (1000, {}),                   # 2 lane-dense tiles + padding
        (1000, {"block_b": 256}),     # 4 tiles of 256 (cap exercised)
    ]
    for B, kw in cases:
        xb = jax.random.normal(jax.random.fold_in(kx, B), (B, DIM), jnp.float32)
        out = jax.block_until_ready(influence_network_forward(xb, w1, b1, w2, b2, **kw))
        ref = _reference(xb, w1, b1, w2, b2)
        assert out.shape == (B, 1), (out.shape, B)
        # bf16 fc1 inputs => relaxed tolerance vs the f32 reference (expected).
        assert jnp.allclose(out, ref, atol=2e-2, rtol=2e-2), f"mismatch at B={B}, kw={kw}"

    print("KERNEL_OK")
</pallas_src>

<mosaic_0001>
module attributes {stable_mosaic.version = 11 : i64} {
  func.func @_mlp_kernel(%arg0: i32, %arg1: memref<16x8xbf16, #tpu.memory_space<vmem>>, %arg2: memref<32x16xbf16, #tpu.memory_space<vmem>>, %arg3: memref<32x1xf32, #tpu.memory_space<vmem>>, %arg4: memref<32x1xf32, #tpu.memory_space<vmem>>, %arg5: memref<1xf32, #tpu.memory_space<smem>>, %arg6: memref<1x8xf32, #tpu.memory_space<vmem>>) attributes {dimension_semantics = [#tpu.dimension_semantics<parallel>], iteration_bounds = array<i64: 1>, scalar_prefetch = 0 : i64, scratch_operands = 0 : i64, tpu.core_type = #tpu.core_type<tc>, window_params = [{transform_indices = @transform_0, window_bounds = array<i64: 16, 8>}, {pipeline_mode = #tpu.pipeline_mode<synchronous>, transform_indices = @transform_1, window_bounds = array<i64: 32, 16>}, {pipeline_mode = #tpu.pipeline_mode<synchronous>, transform_indices = @transform_2, window_bounds = array<i64: 32, 1>}, {pipeline_mode = #tpu.pipeline_mode<synchronous>, transform_indices = @transform_3, window_bounds = array<i64: 32, 1>}, {transform_indices = @transform_4, window_bounds = array<i64: 1>}, {transform_indices = @transform_5, window_bounds = array<i64: 1, 8>}]} {
    %c0 = arith.constant 0 : index
    %c0_0 = arith.constant 0 : index
    %0 = vector.load %arg2[%c0, %c0_0] : memref<32x16xbf16, #tpu.memory_space<vmem>>, vector<32x16xbf16>
    %c0_1 = arith.constant 0 : index
    %c0_2 = arith.constant 0 : index
    %1 = vector.load %arg1[%c0_1, %c0_2] : memref<16x8xbf16, #tpu.memory_space<vmem>>, vector<16x8xbf16>
    %cst = arith.constant dense<0.000000e+00> : vector<32x8xf32>
    %2 = tpu.matmul %0, %1, %cst {dimension_numbers = #tpu.dot_dimension_numbers<[1], [0], [0], [1], [0, 0, 1, 1], [], []>} : vector<32x16xbf16>, vector<16x8xbf16>, vector<32x8xf32> -> vector<32x8xf32>
    %c0_3 = arith.constant 0 : index
    %c0_4 = arith.constant 0 : index
    %3 = vector.load %arg3[%c0_3, %c0_4] : memref<32x1xf32, #tpu.memory_space<vmem>>, vector<32x1xf32>
    %4 = vector.broadcast %3 : vector<32x1xf32> to vector<32x8xf32>
    %5 = arith.addf %2, %4 : vector<32x8xf32>
    %cst_5 = arith.constant 0.000000e+00 : f32
    %6 = vector.broadcast %cst_5 : f32 to vector<32x8xf32>
    %7 = arith.maximumf %5, %6 : vector<32x8xf32>
    %c0_6 = arith.constant 0 : index
    %c0_7 = arith.constant 0 : index
    %8 = vector.load %arg4[%c0_6, %c0_7] : memref<32x1xf32, #tpu.memory_space<vmem>>, vector<32x1xf32>
    %9 = vector.broadcast %8 : vector<32x1xf32> to vector<32x8xf32>
    %10 = arith.mulf %7, %9 : vector<32x8xf32>
    %cst_8 = arith.constant dense<0.000000e+00> : vector<8xf32>
    %11 = vector.multi_reduction <add>, %10, %cst_8 [0] : vector<32x8xf32> to vector<8xf32>
    %12 = vector.shape_cast %11 : vector<8xf32> to vector<1x8xf32>
    %c0_9 = arith.constant 0 : index
    %13 = memref.load %arg5[%c0_9] : memref<1xf32, #tpu.memory_space<smem>>
    %14 = vector.broadcast %13 : f32 to vector<1x8xf32>
    %15 = arith.addf %12, %14 : vector<1x8xf32>
    %c0_10 = arith.constant 0 : index
    %c0_11 = arith.constant 0 : index
    %16 = vector.load %arg6[%c0_10, %c0_11] : memref<1x8xf32, #tpu.memory_space<vmem>>, vector<1x8xf32>
    tpu.vector_store %arg6[%c0_10, %c0_11], %15 {strides = array<i32>} : memref<1x8xf32, #tpu.memory_space<vmem>>, vector<1x8xf32>,
    return
  }
  func.func @transform_0(%arg0: i32) -> (i32, i32) {
    %c0_i32 = arith.constant 0 : i32
    %c0_i32_0 = arith.constant 0 : i32
    return %c0_i32, %arg0 : i32, i32
  }
  func.func @transform_1(%arg0: i32) -> (i32, i32) {
    %c0_i32 = arith.constant 0 : i32
    %c0_i32_0 = arith.constant 0 : i32
    %c0_i32_1 = arith.constant 0 : i32
    return %c0_i32, %c0_i32_0 : i32, i32
  }
  func.func @transform_2(%arg0: i32) -> (i32, i32) {
    %c0_i32 = arith.constant 0 : i32
    %c0_i32_0 = arith.constant 0 : i32
    %c0_i32_1 = arith.constant 0 : i32
    return %c0_i32, %c0_i32_0 : i32, i32
  }
  func.func @transform_3(%arg0: i32) -> (i32, i32) {
    %c0_i32 = arith.constant 0 : i32
    %c0_i32_0 = arith.constant 0 : i32
    %c0_i32_1 = arith.constant 0 : i32
    return %c0_i32, %c0_i32_0 : i32, i32
  }
  func.func @transform_4(%arg0: i32) -> i32 {
    %c0_i32 = arith.constant 0 : i32
    %c0_i32_0 = arith.constant 0 : i32
    return %c0_i32 : i32
  }
  func.func @transform_5(%arg0: i32) -> (i32, i32) {
    %c0_i32 = arith.constant 0 : i32
    %c0_i32_0 = arith.constant 0 : i32
    return %c0_i32, %arg0 : i32, i32
  }
}

</mosaic_0001>

<bundles_post_ra>
// kernel: tpu_custom_call.1
= control target key start
LH: loop header
LB: loop body
LE: loop exit
PB: predicated region body
PF: predicated region fallthrough
CT: control target
= control target key end

     0   :  { %vm69_vm0 = vcmask 130048   ;;  %v235_v3 = vmov 0   ;;  %s315_s0 = inlined_call_operand.vmem [shape: bf16[16,8], index: 0, kind: input, shape index: {}]   ;;  %s316_s1 = inlined_call_operand.vmem [shape: bf16[32,16], index: 1, kind: input, shape index: {}]   ;;  %s317_s2 = inlined_call_operand.vmem [shape: f32[32,1], index: 2, kind: input, shape index: {}]   ;;  %s318_s3 = inlined_call_operand.vmem [shape: f32[32,1], index: 3, kind: input, shape index: {}]   ;;  %s319_s4 = inlined_call_operand.<no memory space> [shape: f32[1], index: 4, kind: input, shape index: {}]   ;;  %s320_s5 = inlined_call_operand.hbm [shape: f32[1,8], index: 5, kind: output, shape index: {}]  }
   0x1   :  { %v208_v0 = vld [vmem:[%s315_s0] sm:$0xff]   ;;  %v210_v2 = vld [vmem:[%s316_s1 + $0x8] sm:$0xff]   ;;  %206 = vset.pattern.permute.xlu0 %v235_v3  ;;  %v31_v5 = vld [vmem:[%s317_s2 + $0x10] sm:$0xff]  ;;  %207 = vset.pattern.permute.xlu1 %v235_v3 }
   0x2   :  { %v209_v1 = vld [vmem:[%s316_s1] sm:$0xff]   ;;  %198 = vmatprep.subr.bf16.mxu0 %v208_v0  ;;  %45 = vperm.xlu1 %207, %v31_v5   ;;  %v30_v6 = vld [vmem:[%s317_s2 + $0x8] sm:$0xff] }
   0x3   :  { %199 = vmatpush3.bf16.msra.mxu0 %v208_v0  ;;  %200 = vmatprep.mubr.msk.bf16.mxu0 %vm69_vm0, %v209_v1  ;;  %v29_v4 = vld [vmem:[%s317_s2] sm:$0xff] }
   0x4   :  { %35 = vperm.xlu0 %206, %v29_v4  }
   0x5   :  { %11 = vsyncpa [#allocation4], 0  ;;  %v32_v7 = vld [vmem:[%s317_s2 + $0x18] sm:$0xff]  ;;  %v129_v8 = vld [vmem:[%s318_s3] sm:$0xff]  ;;  %vm157_vm1 = vcmask 64512   ;;  %v172_v48 = vstv %s319_s4  ;;  %s236_s13 = smov [#allocation3]  }
   0x6   :  { %201 = vmatmul.mubr.msk.bf16.vlgmr.msra.gmra.mrb[0].mxu0 %vm69_vm0, %v210_v2  ;;  %50 = vperm.xlu1 %207, %v32_v7   ;;  %v130_v9 = vld [vmem:[%s318_s3 + $0x8] sm:$0xff]  ;;  %v131_v10 = vld [vmem:[%s318_s3 + $0x10] sm:$0xff]  ;;  %v132_v11 = vld [vmem:[%s318_s3 + $0x18] sm:$0xff]  ;;  %s182_s14 = sshll.u32 %s236_s13, 4  ;;  %vm174_vm2 = vcmask 57344   ;;  %s183_s14 = int_to_ptr.vmem [resolvable:$true] %s182_s14 }
   0x7   :  { %s211_s15 = scalar_lea.vmem %s183_s14, 16  ;;  %s215_s16 = scalar_lea.vmem %s183_s14, 32 }
   0x8   :  { %40 = vperm.xlu0 %206, %v30_v6   ;;  %p212_p0 = scmp.ne.s32.totalorder %s183_s14, %s211_s15  ;;  %p216_p1 = scmp.lt.s32.totalorder %s183_s14, %s183_s14 }
   0x9   :  { %p217_p2 = scmp.lt.s32.totalorder %s215_s16, %s211_s15 }
   0xa   :  { %140 = vperm.xlu1 %207, %v130_v9  }
   0xb   :  { %p218_p3 = por %p217_p2, %p216_p1 }
   0xc   :  { %135 = vperm.xlu0 %206, %v129_v8  }
   0xd   :  { %p219_p4 = pnand %p218_p3, %p212_p0 }
   0xe   :  { %150 = vperm.xlu1 %207, %v132_v11  }
  0x10   :  { %145 = vperm.xlu0 %206, %v131_v10  }
  0x81   :  { %v46_v13 = vpop.permute.xlu1 %45 }
  0x83   :  { %v36_v12 = vpop.permute.xlu0 %35 }
  0x85   :  { %v51_v15 = vpop.permute.xlu1 %50 }
  0x87   :  { %v41_v14 = vpop.permute.xlu0 %40 }
  0x89   :  { %v141_v22 = vpop.permute.xlu1 %140 }
  0x8b   :  { %v136_v17 = vpop.permute.xlu0 %135 }
  0x8d   :  { %v151_v34 = vpop.permute.xlu1 %150 }
  0x8f   :  { %v146_v31 = vpop.permute.xlu0 %145 }
  0xd9   :  { %v202_v16 = vpop.f32.mrb[0].mxu0 }
  0xda   :  { %v119_v18 = vadd.f32 %v202_v16, %v46_v13  ;;  %v110_v19 = vpop.f32.mrb[1].mxu0 }
  0xdb   :  { %v111_v20 = vadd.f32 %v110_v19, %v36_v12  ;;  %v203_v21 = vpop.f32.mrb[2].mxu0 }
  0xdc   :  { %v122_v23 = vadd.f32 %v203_v21, %v51_v15  ;;  %v113_v24 = vpop.f32.mrb[3].mxu0  ;;  %v127_v25 = vmax.f32 %v119_v18, 0.0 }
  0xdd   :  { %v125_v26 = vmax.f32 %v111_v20, 0.0  ;;  %v114_v27 = vadd.f32 %v113_v24, %v41_v14 }
  0xde   :  { %v128_v29 = vmax.f32 %v122_v23, 0.0  ;;  %v155_v32 = vmul.f32 %v146_v31, %v127_v25 }
  0xdf   :  { %v153_v28 = vmul.f32 %v136_v17, %v125_v26  ;;  %v126_v30 = vmax.f32 %v114_v27, 0.0 }
  0xe0   :  { %v156_v36 = vmul.f32 %v151_v34, %v128_v29  ;;  %v161_v39 = vsel %vm157_vm1, %v155_v32, 0.0 }
  0xe1   :  { %v154_v33 = vmul.f32 %v141_v22, %v126_v30  ;;  %v158_v35 = vsel %vm157_vm1, %v153_v28, 0.0 }
  0xe2   :  { %v163_v41 = vsel %vm157_vm1, %v156_v36, 0.0 }
  0xe3   :  { %v159_v37 = vsel %vm157_vm1, %v154_v33, 0.0 }
  0xe4   :  { %v160_v38 = vadd.f32 %v159_v37, %v158_v35 }
  0xe6   :  { %v162_v40 = vadd.f32 %v161_v39, %v160_v38 }
  0xe8   :  { %v164_v42 = vadd.f32 %v163_v41, %v162_v40 }
  0xea   :  { %v165_v43 = vrot.slane %v164_v42, 4 }
  0xec   :  { %v166_v44 = vadd.f32 %v165_v43, %v164_v42 }
  0xee   :  { %v167_v45 = vrot.slane %v166_v44, 2 }
  0xf0   :  { %v168_v46 = vadd.f32 %v167_v45, %v166_v44 }
  0xf2   :  { %v169_v47 = vrot.slane %v168_v46, 1 }
  0xf4   :  { %v170_v49 = vadd.f32 %v169_v47, %v168_v46 }
  0xf6   :  { %v173_v50 = vadd.f32 %v172_v48, %v170_v49 }
  0xf8   :  { %175 = vst.msk [vmem:[#allocation3] sm:$0x1] %vm174_vm2, %v173_v50 }
  0xf9   :  { %222 = shalt.err (!%p219_p4)
}
  0xfa   :  { %s223_s19 = scalar_lea.hbm %s320_s5, 16 }
  0xfb   :  { %p224_p5 = scmp.ne.s32.totalorder %s320_s5, %s223_s19  ;;  %p227_p6 = scmp.lt.u32.totalorder %s223_s19, %s320_s5 }
  0xfd   :  { %p229_p7 = pnand %p227_p6, %p224_p5 }
  0xff   :  { %232 = shalt.err (!%p229_p7)
}
 0x100   :  { %185 = dma.vmem_to_hbm [thread:$0]  %s183_s14, 16, %s320_s5, [#allocation4]  }
 0x101   :  { %233 = dma.done.wait [#allocation4], 16  }
 0x102   :  { %234 = vsyncadd [#allocation4], 4294967280 }
 0x103   :  { %189 = vsyncpa [#allocation4], 1 }

</bundles_post_ra>
